<compile_context>
chip_gen: v7x
topology: tpu7x:2x2x1
jax: 0.10.0
libtpu: 0.0.40
codegen_flags: <defaults>
</compile_context>

<pallas_src>
import jax
import jax.numpy as jnp
from jax.experimental import pallas as pl
from jax.experimental.pallas import tpu as pltpu


def _round_up(x, m):
    return ((x + m - 1) // m) * m


def _encode_kernel(x_ref, mask_ref, w_ref, o_ref):
    # x_ref:    (tM, H)  flattened query-token embeddings (storage dtype)
    # mask_ref: (tM, 1)  attention mask (0/1), one value per token row
    # w_ref:    (H, D)   compression projection (compute dtype)
    # o_ref:    (tM, D)  normalized, masked token vectors
    x = x_ref[...].astype(w_ref.dtype)                  # in-kernel cast: no wrapper pass
    y = jnp.dot(x, w_ref[...],
                preferred_element_type=jnp.float32)     # (tM, D) f32 on MXU
    sq = jnp.sum(y * y, axis=-1, keepdims=True)         # (tM, 1)
    # Fuse mask into the normalization scale: one (tM, D) VPU multiply total.
    # Ragged last-tile garbage rows cannot corrupt valid rows (row-independent)
    # and their stores are masked off by Pallas; masked rows -> exact zeros.
    scale = mask_ref[...].astype(jnp.float32) * jax.lax.rsqrt(sq + 1e-12)
    o_ref[...] = (y * scale).astype(o_ref.dtype)


def _vmem_estimate_bytes(tm, h, d, x_itemsize, c_itemsize):
    # BlockSpec double-buffers every stream; the weight's block index is
    # constant (DMA'd once) but two buffers are still reserved.  The f32
    # matmul result + scaled temp live in VMEM/vregs before the narrow store.
    return (2 * tm * h * x_itemsize          # x tiles
            + 2 * tm * 1 * 4                 # mask tiles
            + 2 * tm * d * c_itemsize        # out tiles
            + 2 * h * d * c_itemsize         # weight buffers
            + 2 * tm * d * 4)                # f32 intermediates (y, y*scale)


def _pick_tile_m(m, h, d, x_itemsize, c_itemsize, budget_bytes, tile_m=1024):
    # Tiny problems: one tile equal to the full extent (block == full dim is legal).
    if m <= 8:
        return m
    # Keep at least 2 grid steps so megacore / v7x's two TensorCores both get
    # work even for small query batches, then shrink to the VMEM budget.
    tm = min(tile_m, _round_up(pl.cdiv(m, 2), 8))
    tm = max(8, (tm // 8) * 8)
    while tm > 8 and _vmem_estimate_bytes(tm, h, d, x_itemsize, c_itemsize) > budget_bytes:
        tm = max(8, tm // 2)
    return tm


def query_searcher_head(seq_embeds, attention_mask, w_compress,
                        use_fp16=True, tile_m=1024):
    """Encode path of QuerySearcherHead.

    seq_embeds:     [B, S, H] embedded query tokens (post embedding lookup)
    attention_mask: [B, S]    0/1 mask
    w_compress:     [H, D]    per-token compression projection
    returns:        [B, S, D] L2-normalized, masked token vectors
    """
    B, S, H = seq_embeds.shape
    D = w_compress.shape[1]
    compute_dtype = jnp.bfloat16 if use_fp16 else jnp.float32
    c_itemsize = jnp.dtype(compute_dtype).itemsize
    x_itemsize = jnp.dtype(seq_embeds.dtype).itemsize

    # Layout plumbing only: contiguous reshapes, no extra HBM passes over x.
    M = B * S
    x = seq_embeds.reshape(M, H)
    mask = attention_mask.reshape(M, 1)
    w = w_compress.astype(compute_dtype)            # tiny one-time parameter cast

    # Per-generation VMEM budget (v5e/v6e: 128 MiB physical, v7x: 64 MiB/TC).
    try:
        vmem_cap = int(pltpu.get_tpu_info().vmem_capacity_bytes)
    except Exception:
        vmem_cap = 64 << 20                          # conservative (v7x per-core)
    budget = min(vmem_cap // 2, 40 << 20)

    tM = _pick_tile_m(M, H, D, x_itemsize, c_itemsize, budget, tile_m=tile_m)
    grid = (pl.cdiv(M, tM),)

    est = _vmem_estimate_bytes(tM, H, D, x_itemsize, c_itemsize)
    # Raise the scoped limit only when the tile estimate exceeds the smallest
    # default (v5e: 16 MiB), capped well under physical VMEM per generation
    # (<= 48 MiB on v7x, higher allowed on the 128 MiB parts).
    vmem_limit = (None if est <= (16 << 20)
                  else min(int(est * 3 // 2), (vmem_cap * 3) // 4))

    out = pl.pallas_call(
        _encode_kernel,
        out_shape=jax.ShapeDtypeStruct((M, D), compute_dtype),
        grid_spec=pltpu.PrefetchScalarGridSpec(
            num_scalar_prefetch=0,
            grid=grid,
            in_specs=[
                pl.BlockSpec((tM, H), lambda i: (i, 0)),   # full H: no K padding
                pl.BlockSpec((tM, 1), lambda i: (i, 0)),   # per-row mask
                # Constant block index -> DMA'd once across the grid.
                # TODO(synk): pipeline_mode=pl.Buffered(1) (or a one-shot VMEM
                # scratch load) would drop the second reserved weight buffer;
                # only material when H*D reaches hundreds of KiB.
                pl.BlockSpec((H, D), lambda i: (0, 0)),
            ],
            out_specs=pl.BlockSpec((tM, D), lambda i: (i, 0)),
        ),
        compiler_params=pltpu.CompilerParams(
            dimension_semantics=("parallel",),
            vmem_limit_bytes=vmem_limit),
    )(x, mask, w)

    # Free reshape back to [B, S, D]; no slice (output was written unpadded).
    return out.reshape(B, S, D)
    # TODO(synk): for very large H, add a K ('arbitrary') grid axis with an f32
    # VMEM accumulator + pl.when init/finalize -- only once the weight + x tile
    # genuinely exceed the budget (happens ~2x earlier on v7x's 64 MiB VMEM;
    # on v5e/v6e prefer keeping the full weight resident with a large K tile).


def reference(seq_embeds, attention_mask, w_compress):
    x = seq_embeds.astype(jnp.float32)
    y = jnp.einsum("bsh,hd->bsd", x, w_compress.astype(jnp.float32))
    y = y / jnp.sqrt(jnp.sum(y * y, axis=-1, keepdims=True) + 1e-12)
    y = y * attention_mask.astype(jnp.float32)[..., None]
    return y


if __name__ == "__main__":
    key = jax.random.PRNGKey(0)
    B, S, H, D = 2, 8, 32, 16
    VOCAB = 100

    k_emb, k_w, k_ids = jax.random.split(key, 3)
    # Deterministic synthetic parameters (the wrapper module owns no params;
    # these belong to the wrapped neural_ir_model).  The embedding table is
    # stored in bf16 (autocast-style) so the gathered activations stream into
    # the kernel at half width with no wrapper-side cast/pad pass.
    embedding_table = (jax.random.normal(k_emb, (VOCAB, H), jnp.float32)
                       * 0.02).astype(jnp.bfloat16)
    w_compress = jax.random.normal(k_w, (H, D), jnp.float32) * 0.02

    # seq = {"input_ids": ..., "attention_mask": ...}
    input_ids = jax.random.randint(k_ids, (B, S), 0, VOCAB)
    attention_mask = jnp.array(
        [[1, 1, 1, 1, 1, 1, 0, 0],
         [1, 1, 1, 1, 0, 0, 0, 0]], dtype=jnp.float32)

    # TODO(synk): fuse this gather into the kernel (scalar-prefetch input_ids +
    # row-gather DMA on the embedding table) so seq_embeds never hits HBM.
    seq_embeds = embedding_table[input_ids]                    # [B, S, H] bf16

    vectors = query_searcher_head(seq_embeds, attention_mask, w_compress,
                                  use_fp16=True)
    vectors = jax.block_until_ready(vectors)

    ref = reference(seq_embeds, attention_mask, w_compress)
    assert vectors.shape == (B, S, D), vectors.shape
    assert vectors.dtype == jnp.bfloat16, vectors.dtype
    err = jnp.max(jnp.abs(vectors.astype(jnp.float32) - ref))
    assert err < 5e-2, f"max abs err {err}"

    print("KERNEL_OK")
</pallas_src>

<mosaic_0001>
module attributes {stable_mosaic.version = 11 : i64} {
  func.func @_encode_kernel(%arg0: i32, %arg1: memref<8x32xbf16, #tpu.memory_space<vmem>>, %arg2: memref<8x1xf32, #tpu.memory_space<vmem>>, %arg3: memref<32x16xbf16, #tpu.memory_space<vmem>>, %arg4: memref<8x16xbf16, #tpu.memory_space<vmem>>) attributes {dimension_semantics = [#tpu.dimension_semantics<parallel>], iteration_bounds = array<i64: 2>, scalar_prefetch = 0 : i64, scratch_operands = 0 : i64, tpu.core_type = #tpu.core_type<tc>, window_params = [{transform_indices = @transform_0, window_bounds = array<i64: 8, 32>}, {transform_indices = @transform_1, window_bounds = array<i64: 8, 1>}, {pipeline_mode = #tpu.pipeline_mode<synchronous>, transform_indices = @transform_2, window_bounds = array<i64: 32, 16>}, {transform_indices = @transform_3, window_bounds = array<i64: 8, 16>}]} {
    %c0 = arith.constant 0 : index
    %c0_0 = arith.constant 0 : index
    %0 = vector.load %arg1[%c0, %c0_0] : memref<8x32xbf16, #tpu.memory_space<vmem>>, vector<8x32xbf16>
    %c0_1 = arith.constant 0 : index
    %c0_2 = arith.constant 0 : index
    %1 = vector.load %arg3[%c0_1, %c0_2] : memref<32x16xbf16, #tpu.memory_space<vmem>>, vector<32x16xbf16>
    %cst = arith.constant dense<0.000000e+00> : vector<8x16xf32>
    %2 = tpu.matmul %0, %1, %cst {dimension_numbers = #tpu.dot_dimension_numbers<[1], [0], [0], [1], [0, 0, 1, 1], [], []>} : vector<8x32xbf16>, vector<32x16xbf16>, vector<8x16xf32> -> vector<8x16xf32>
    %3 = arith.mulf %2, %2 : vector<8x16xf32>
    %cst_3 = arith.constant dense<0.000000e+00> : vector<8xf32>
    %4 = vector.multi_reduction <add>, %3, %cst_3 [1] : vector<8x16xf32> to vector<8xf32>
    %5 = vector.shape_cast %4 : vector<8xf32> to vector<8x1xf32>
    %c0_4 = arith.constant 0 : index
    %c0_5 = arith.constant 0 : index
    %6 = vector.load %arg2[%c0_4, %c0_5] : memref<8x1xf32, #tpu.memory_space<vmem>>, vector<8x1xf32>
    %cst_6 = arith.constant 9.99999996E-13 : f32
    %7 = vector.broadcast %cst_6 : f32 to vector<8x1xf32>
    %8 = arith.addf %5, %7 : vector<8x1xf32>
    %9 = math.rsqrt %8 : vector<8x1xf32>
    %10 = arith.mulf %6, %9 : vector<8x1xf32>
    %11 = vector.broadcast %10 : vector<8x1xf32> to vector<8x16xf32>
    %12 = arith.mulf %2, %11 : vector<8x16xf32>
    %13 = arith.truncf %12 : vector<8x16xf32> to vector<8x16xbf16>
    %c0_7 = arith.constant 0 : index
    %c0_8 = arith.constant 0 : index
    %14 = vector.load %arg4[%c0_7, %c0_8] : memref<8x16xbf16, #tpu.memory_space<vmem>>, vector<8x16xbf16>
    tpu.vector_store %arg4[%c0_7, %c0_8], %13 {strides = array<i32>} : memref<8x16xbf16, #tpu.memory_space<vmem>>, vector<8x16xbf16>,
    return
  }
  func.func @transform_0(%arg0: i32) -> (i32, i32) {
    %c0_i32 = arith.constant 0 : i32
    %c0_i32_0 = arith.constant 0 : i32
    return %arg0, %c0_i32 : i32, i32
  }
  func.func @transform_1(%arg0: i32) -> (i32, i32) {
    %c0_i32 = arith.constant 0 : i32
    %c0_i32_0 = arith.constant 0 : i32
    return %arg0, %c0_i32 : i32, i32
  }
  func.func @transform_2(%arg0: i32) -> (i32, i32) {
    %c0_i32 = arith.constant 0 : i32
    %c0_i32_0 = arith.constant 0 : i32
    %c0_i32_1 = arith.constant 0 : i32
    return %c0_i32, %c0_i32_0 : i32, i32
  }
  func.func @transform_3(%arg0: i32) -> (i32, i32) {
    %c0_i32 = arith.constant 0 : i32
    %c0_i32_0 = arith.constant 0 : i32
    return %arg0, %c0_i32 : i32, i32
  }
}

</mosaic_0001>

<bundles_post_ra>
// kernel: tpu_custom_call.1
= control target key start
LH: loop header
LB: loop body
LE: loop exit
PB: predicated region body
PF: predicated region fallthrough
CT: control target
= control target key end

     0   :  { %8 = vsyncpa [#allocation3], 0  ;;  %s617_s0 = inlined_call_operand.vmem [shape: bf16[16,32], index: 0, kind: input, shape index: {}]   ;;  %s618_s1 = inlined_call_operand.vmem [shape: f32[16,1], index: 1, kind: input, shape index: {}]   ;;  %s619_s2 = inlined_call_operand.vmem [shape: bf16[32,16], index: 2, kind: input, shape index: {}]   ;;  %s620_s3 = inlined_call_operand.hbm [shape: bf16[16,16], index: 3, kind: output, shape index: {}]  }
   0x1   :  { %10 = vsyncpa [#allocation3 + $0x1], 0  ;;  %s508_s12 = smov 0   ;;  %s510_s13 = smov 0  }
   0x2   :  { %s512_s14 = smov 0   ;;  %s514_s15 = smov 0  }
   0x3 LB: > { %s529_s16 = sadd.s32 4294967295, %s482_s15   ;;  %s348_s17 = sadd.s32 4294967294, %s482_s15   ;;  %s482_s15 = sphi %s514_s15, %s626_s15   ;;  %s478_s14 = sphi %s512_s14, %s625_s14   ;;  %s474_s13 = sphi %s510_s13, %s624_s13   ;;  %s470_s12 = sphi %s508_s12, %s623_s12  }
   0x4   : > { %s533_s18 = sadd.s32 1, %s482_s15   ;;  %s96_s19 = sadd.s32 1, %s478_s14 }
   0x5   : > { %s93_s20 = ssub.s32 %s482_s15, %s533_s18  ;;  %p106_p0 = scmp.ne.s32.totalorder %s478_s14, %s474_s13 }
   0x6   : > { %p94_p1 = scmp.eq.s32.totalorder %s93_s20, 0  ;;  %p107_p2 = scmp.eq.s32.totalorder %s529_s16, 1 }
   0x7   : > { %p112_p3 = scmp.ne.s32.totalorder %s474_s13, %s470_s12  ;;  %p113_p4 = scmp.eq.s32.totalorder %s348_s17, 1 }
   0x8   : > { %s544_s21 = scalar_select %p94_p1, %s478_s14, %s96_s19  }
   0x9   : > { %p546_p5 = por %p107_p2, %p106_p0  ;;  %p550_p6 = por %p113_p4, %p112_p3 }
   0xa   : > { %p351_p7 = scmp.ge.s32.totalorder %s482_s15, 1  ;;  %p148_p8 = scmp.lt.s32.totalorder %s482_s15, 3 }
   0xc   : > { %p149_p9 = pnand %p351_p7, %p148_p8 }
   0xd   : > { %v416_v0 = vld [vmem:[%s619_s2] sm:$0xff] (!%p149_p9)   ;;  %v484_v1 = vmov (!%p149_p9), 0.0   ;;  %v417_v2 = vld [vmem:[%s619_s2 + $0x8] sm:$0xff] (!%p149_p9)   ;;  %vm485_vm0 = vmmov (!%p149_p9), 0   ;;  %p175_p10 = scmp.lt.s32.totalorder (!%p149_p9), %s529_s16, 1  ;;  %vm201_vm1 = vcmask (!%p149_p9), 261120  }
   0xe   : > { %152 = sbr.rel (%p149_p9) target bundleno = 544 (0x220), region = 32  ;;  %365 = vmatprep.subr.bf16.mxu0 (!%p149_p9), %v484_v1  ;;  %369 = vmatprep.mubr.msk.bf16.mxu0 (!%p149_p9), %vm485_vm0, %v484_v1  ;;  %vm246_vm2 = vcmask (!%p149_p9), 130048   ;;  %v486_v10 = vmov (!%p149_p9), 0   ;;  %s172_s10 = sand.u32 (!%p149_p9), 1, %s474_s13   ;;  %vm261_vm3 = vcmask (!%p149_p9), 125952  }
   0xf   : > { %366 = vmatpush3.bf16.msra.mxu0 (!%p149_p9), %v416_v0  ;;  %415 = vset.pattern.permute.xlu0 (!%p149_p9), %v486_v10  ;;  %s352_s11 = sshll.u32 (!%p149_p9), %s172_s10, 2  ;;  %s359_s17 = sshll.u32 (!%p149_p9), %s529_s16, 6 }
  0x10   : > { %367 = vmatprep.subr.bf16.mxu0 (!%p149_p9), %v484_v1  ;;  %s174_s19 = scalar_lea.vmem (!%p149_p9), [#allocation2], %s352_s11  ;;  %s575_s26 = scalar_lea.hbm (!%p149_p9), %s620_s3, %s359_s17 }
  0x11   : > { %s277_s20 = sshll.u32 (!%p149_p9), %s174_s19, 4  ;;  %s264_s27 = scalar_lea.sflag (!%p149_p9), [#allocation3], %s172_s10  ;;  %s577_s20 = int_to_ptr.vmem [resolvable:$true] %s277_s20 }
  0x13   : > { %368 = vmatpush3.bf16.msra.mxu0 (!%p149_p9), %v417_v2 }
  0x15   : > { %s176_s28 = scalar_select %p175_p10, %s529_s16, 1 }
  0x16   : > { %s487_s16 = smov [#allocation2]  }
  0x17   : > { %s353_s29 = sshll.u32 %s176_s28, 2  ;;  %s354_s6 = sshll.u32 %s176_s28, 3 }
  0x18   : > { %s178_s5 = scalar_lea.vmem %s617_s0, %s353_s29  ;;  %s182_s9 = scalar_lea.vmem %s618_s1, %s354_s6 }
  0x19   : > { %v184_v3 = vld [vmem:[%s178_s5] sm:$0xf]  ;;  %s420_s28 = scalar_lea.vmem %s577_s20, 64  ;;  %s424_s29 = sshll.u32 %s487_s16, 4  ;;  %s425_s29 = int_to_ptr.vmem [resolvable:$false] %s424_s29 }
  0x1a   : > { %370 = vmatmul.mubr.msk.bf16.vlgmr.msra.gmra.mrb[0].mxu0 %vm201_vm1, %v184_v3  ;;  %v250_v13 = vld [vmem:[%s182_s9] sm:$0xff]  ;;  %p421_p11 = scmp.ne.s32.totalorder %s577_s20, %s420_s28  ;;  %s426_s30 = scalar_lea.vmem %s425_s29, 128 }
  0x1b   : > { %p427_p0 = scmp.lt.s32.totalorder %s577_s20, %s425_s29  ;;  %p428_p1 = scmp.lt.s32.totalorder %s426_s30, %s420_s28 }
  0x1c   : > { %p422_p12 = pnand %p421_p11, %p546_p5 }
  0x1d   : > { %p429_p2 = por %p428_p1, %p427_p0 }
  0x1e   : > { %p423_p13 = pneg %p422_p12 }
  0x20   : > { %p430_p3 = pnand %p429_p2, %p423_p13 }
  0xed   : > { %v239_v4 = vpop.f32.mrb[0].mxu0 }
  0xee   : > { %v371_v5 = vpop.f32.mrb[1].mxu0  ;;  %v245_v6 = vmul.f32 %v239_v4, %v239_v4 }
  0xef   : > { %v242_v7 = vpop.f32.mrb[2].mxu0 }
  0xf0   : > { %v372_v8 = vpop.f32.mrb[3].mxu0  ;;  %v247_v9 = vsel %vm246_vm2, %v245_v6, 0.0 }
  0xf1   : > { %248 = vadd.xlane.f32.xlu0 %v247_v9 }
 0x17e   : > { %v249_v11 = vpop.xlane.xlu0 %248 }
 0x17f   : > { %v251_v12 = vadd.f32 1e-12, %v249_v11 }
 0x181   : > { %418 = vrsqrt.f32 %v251_v12 }
 0x18b   : > { %v419_v14 = vpop.eup %418 }
 0x18c   : > { %v253_v15 = vmul.f32 %v419_v14, %v250_v13 }
 0x18e   : > { %256 = vperm.xlu0 %415, %v253_v15  }
 0x20d   : > { %v257_v16 = vpop.permute.xlu0 %256 }
 0x20e   : > { %v259_v17 = vmul.f32 %v257_v16, %v239_v4 }
 0x210   : > { %v260_v18 = vpack.c.bf16 %v259_v17, %v259_v17 }
 0x212   : > { %262 = vst.msk [vmem:[%s174_s19] sm:$0xf] %vm261_vm3, %v260_v18 }
 0x213   : > { %433 = shalt.err (!%p430_p3)
}
 0x214   : > { %s434_s4 = scalar_lea.hbm %s575_s26, 64  ;;  %s438_s7 = scalar_lea.hbm %s620_s3, 128 }
 0x215   : > { %p435_p4 = scmp.ne.s32.totalorder %s575_s26, %s434_s4  ;;  %p439_p9 = scmp.lt.u32.totalorder %s575_s26, %s620_s3 }
 0x216   : > { %p440_p10 = scmp.lt.u32.totalorder %s438_s7, %s434_s4  ;;  %p442_p12 = scmp.lt.u32.totalorder %s434_s4, %s575_s26 }
 0x217   : > { %p436_p7 = pnand %p435_p4, %p546_p5 }
 0x218   : > { %p441_p11 = por %p440_p10, %p439_p9 }
 0x219   : > { %p437_p8 = pneg %p436_p7 }
 0x21a   : > { %p443_p13 = por %p442_p12, %p441_p11 }
 0x21c   : > { %p444_p0 = pnand %p443_p13, %p437_p8 }
 0x21e   : > { %447 = shalt.err (!%p444_p0)
}
 0x21f   : > { %373 = dma.vmem_to_hbm [thread:$0]  (%p546_p5), %s577_s20, 64, %s575_s26, %s264_s27  }
 0x220 PF: > { %p379_p1 = scmp.ge.s32.totalorder %s482_s15, 2  ;;  %s289_s10 = sand.u32 1, %s470_s12  }
 0x221   : > { %s290_s11 = scalar_lea.sflag [#allocation3], %s289_s10 }
 0x222   : > { %p376_p2 = pnand %p379_p1, %p550_p6 }
 0x224   : > { %465 = dma.done.wait (!%p376_p2), %s290_s11, 64  }
 0x225   : > { %467 = vsyncadd (!%p376_p2), %s290_s11, 4294967232  ;;  %p13_p3 = scmp.ge.s32.totalorder %s533_s18, 4   ;;  %s623_s12 = smov %s474_s13 }
 0x226   : > { %s624_s13 = smov %s478_s14  ;;  %s625_s14 = smov %s544_s21 }
 0x227   : > { %s626_s15 = smov %s533_s18  ;;  %15 = sbr.rel (!%p13_p3) target bundleno = 3 (0x3), region = 70 }
 0x22e   :  { %295 = vsyncpa [#allocation3], 1 }
 0x22f   :  { %297 = vsyncpa [#allocation3 + $0x1], 1 }

</bundles_post_ra>
